<compile_context>
chip_gen: v6e
topology: v6e:2x2x1
jax: 0.10.0
libtpu: 0.0.40
codegen_flags: <defaults>
</compile_context>

<pallas_src>
import jax
import jax.numpy as jnp
from jax import lax
from jax.experimental import pallas as pl
from jax.experimental.pallas import tpu as pltpu


_TILE_LADDER = (8192, 4096, 2048, 1024, 512, 256, 128)
# 8192 points * 64 ch * 4 B = 2 MiB of output per grid step.
_TARGET_POINTS_PER_STEP = 8192


def _round_up(x, m):
    return (x + m - 1) // m * m


def _pick_tiles(B, Np):
    """Choose (bb, tn): batch fold and lane-dense N tile.  Np % 128 == 0."""
    tn = 128
    for t in _TILE_LADDER:
        if Np % t == 0:
            tn = t
            break
    n_steps = Np // tn
    # Keep >=2 total grid steps when the problem allows it (v7x: 2 TensorCores).
    min_steps = min(2, B * n_steps)
    bb = 1
    for cand in range(B, 0, -1):
        if B % cand != 0:
            continue
        if cand * tn > _TARGET_POINTS_PER_STEP:
            continue
        if (B // cand) * n_steps < min_steps:
            continue
        bb = cand
        break
    return bb, tn


def _conv_bn_relu_kernel(x_ref, w_ref, shift_ref, o_ref):
    # x_ref:     (bb, tn, 3)   native channels-last input tile
    # w_ref:     (64, 3)       conv1 weight with BN scale folded in
    # shift_ref: (64, 1)       per-channel shift (conv bias + BN folded)
    # o_ref:     (bb, 64, tn)  channels-first output tile (lane-dense store)
    w = w_ref[...]
    shift = shift_ref[...]
    for b in range(x_ref.shape[0]):        # small static unroll over folded batch
        x = x_ref[b]                        # (tn, 3)
        # out[o, n] = sum_c w[o, c] * x[n, c]   (trans-B contraction, K=3)
        h = lax.dot_general(
            w, x,
            dimension_numbers=(((1,), (1,)), ((), ())),
            preferred_element_type=jnp.float32)            # (64, tn)
        o_ref[b] = jnp.maximum(h + shift, 0.0).astype(o_ref.dtype)


def transform_classification_forward(data_in, params, use_tnet=False,
                                      out_dtype=jnp.float32):
    """data_in: (B, N, 3) float32 point cloud.

    Returns (x_flat, mtx_in, mtx_feature) matching the PyTorch module:
      x_flat:      (B, 64 * N)   -- Flatten(1) of the (B, 64, N) feature map
      mtx_in:      (B, 3, 3)
      mtx_feature: (B, 64, 64)
    """
    assert not use_tnet, "use_tnet=True path is NotImplementedError in source"
    B, N, C = data_in.shape
    assert C == 3

    # use_tnet=False branch: identity transforms, repeated per batch.  They are
    # mathematically no-ops on x, so they are NOT applied in-kernel.  (They are
    # returned batched only because the torch forward contract requires it.)
    mtx_in = jnp.broadcast_to(jnp.eye(3, dtype=jnp.float32), (B, 3, 3))
    mtx_feature = jnp.broadcast_to(jnp.eye(64, dtype=jnp.float32), (B, 64, 64))

    w1 = params["conv1_w"].astype(jnp.float32)       # (64, 3)
    b1 = params["conv1_b"].astype(jnp.float32)       # (64,)
    gamma = params["bn1_gamma"].astype(jnp.float32)  # (64,)
    beta = params["bn1_beta"].astype(jnp.float32)    # (64,)
    mean = params["bn1_mean"].astype(jnp.float32)    # (64,)
    var = params["bn1_var"].astype(jnp.float32)      # (64,)
    eps = 1e-5

    # Fold conv bias + BN (eval mode) into the weight and a per-channel shift.
    scale = gamma / jnp.sqrt(var + eps)               # (64,)
    w_eff = w1 * scale[:, None]                       # (64, 3)
    shift2d = (beta + (b1 - mean) * scale).reshape(64, 1)

    # Pad N up to a multiple of 128 so the output store is always lane-dense
    # and the grid divides exactly (input pad is only 12 B/point).
    Np = _round_up(N, 128)
    x_p = data_in.astype(jnp.float32)
    if Np != N:
        x_p = jnp.pad(x_p, ((0, 0), (0, Np - N), (0, 0)))

    bb, tn = _pick_tiles(B, Np)
    grid = (B // bb, Np // tn)

    feat = pl.pallas_call(
        _conv_bn_relu_kernel,
        out_shape=jax.ShapeDtypeStruct((B, 64, Np), out_dtype),
        grid_spec=pltpu.PrefetchScalarGridSpec(
            num_scalar_prefetch=0,
            grid=grid,
            in_specs=[
                pl.BlockSpec((bb, tn, 3), lambda b, n: (b, n, 0)),  # points tile
                pl.BlockSpec((64, 3), lambda b, n: (0, 0)),         # folded W
                pl.BlockSpec((64, 1), lambda b, n: (0, 0)),         # shift
            ],
            out_specs=pl.BlockSpec((bb, 64, tn), lambda b, n: (b, 0, n)),
        ),
        compiler_params=pltpu.CompilerParams(
            dimension_semantics=("parallel", "parallel"),
            vmem_limit_bytes=32 * 1024 * 1024),
    )(x_p, w_eff, shift2d)

    if Np != N:
        # TODO(synk): for N % 128 != 0 this slice is an extra HBM pass over the
        # output; a bounds-masked last tile would remove it at the cost of
        # masked partial stores.
        feat = feat[:, :, :N]

    # Output is already (B, 64, N): Flatten(1) is a free reshape, no transpose.
    x_flat = feat.reshape(B, 64 * N)
    return x_flat, mtx_in, mtx_feature


def _init_params(key):
    k_w, k_b, k_g, k_be, k_m, k_v = jax.random.split(key, 6)
    return {
        "conv1_w": jax.random.normal(k_w, (64, 3), jnp.float32) * 0.1,
        "conv1_b": jax.random.normal(k_b, (64,), jnp.float32) * 0.1,
        "bn1_gamma": 1.0 + 0.1 * jax.random.normal(k_g, (64,), jnp.float32),
        "bn1_beta": 0.1 * jax.random.normal(k_be, (64,), jnp.float32),
        "bn1_mean": 0.1 * jax.random.normal(k_m, (64,), jnp.float32),
        "bn1_var": 1.0 + 0.1 * jax.random.uniform(k_v, (64,), jnp.float32),
    }


def _reference_forward(data_in, params):
    # Pure-JAX reference of the same math (torch eval-mode BN), for checking.
    B, N, _ = data_in.shape
    eps = 1e-5
    mtx_in = jnp.broadcast_to(jnp.eye(3, dtype=jnp.float32), (B, 3, 3))
    mtx_feature = jnp.broadcast_to(jnp.eye(64, dtype=jnp.float32), (B, 64, 64))
    x = jnp.einsum("bnc,bcd->bnd", data_in, mtx_in)                 # (B, N, 3)
    y = jnp.einsum("bnc,oc->bno", x, params["conv1_w"]) + params["conv1_b"]
    y = (y - params["bn1_mean"]) / jnp.sqrt(params["bn1_var"] + eps)
    y = y * params["bn1_gamma"] + params["bn1_beta"]
    y = jnp.maximum(y, 0.0)                                         # (B, N, 64)
    y = jnp.einsum("bnc,bcd->bnd", y, mtx_feature)                  # (B, N, 64)
    x_flat = jnp.transpose(y, (0, 2, 1)).reshape(B, 64 * N)
    return x_flat, mtx_in, mtx_feature


if __name__ == "__main__":
    key = jax.random.PRNGKey(0)
    k_params, k_data = jax.random.split(key)
    params = _init_params(k_params)

    # Small point cloud: 2 batches, 16 points (exercises the N-padding path).
    B, N = 2, 16
    data_in = jax.random.normal(k_data, (B, N, 3), jnp.float32)

    x_flat, mtx_in, mtx_feature = transform_classification_forward(
        data_in, params, use_tnet=False)
    jax.block_until_ready((x_flat, mtx_in, mtx_feature))

    x_ref, mi_ref, mf_ref = _reference_forward(data_in, params)
    assert x_flat.shape == (B, 64 * N)
    assert mtx_in.shape == (B, 3, 3)
    assert mtx_feature.shape == (B, 64, 64)
    assert jnp.allclose(x_flat, x_ref, atol=1e-4, rtol=1e-4)
    assert jnp.allclose(mtx_in, mi_ref)
    assert jnp.allclose(mtx_feature, mf_ref)

    # Lane-aligned N (no padding / no slice path), f32 output.
    B2, N2 = 2, 256
    data2 = jax.random.normal(jax.random.PRNGKey(1), (B2, N2, 3), jnp.float32)
    xf2, _, _ = transform_classification_forward(data2, params)
    xr2, _, _ = _reference_forward(data2, params)
    jax.block_until_ready(xf2)
    assert jnp.allclose(xf2, xr2, atol=1e-4, rtol=1e-4)

    # Optional bf16 writeback path (halves dominant HBM traffic downstream).
    xb16, _, _ = transform_classification_forward(
        data2, params, out_dtype=jnp.bfloat16)
    jax.block_until_ready(xb16)
    assert xb16.dtype == jnp.bfloat16
    assert jnp.allclose(xb16.astype(jnp.float32), xr2, atol=3e-2, rtol=3e-2)

    print("KERNEL_OK")
</pallas_src>

<mosaic_0001>
module attributes {stable_mosaic.version = 11 : i64} {
  func.func @_conv_bn_relu_kernel(%arg0: i32, %arg1: i32, %arg2: memref<1x128x3xf32, #tpu.memory_space<vmem>>, %arg3: memref<64x3xf32, #tpu.memory_space<vmem>>, %arg4: memref<64x1xf32, #tpu.memory_space<vmem>>, %arg5: memref<1x64x128xf32, #tpu.memory_space<vmem>>) attributes {dimension_semantics = [#tpu.dimension_semantics<parallel>, #tpu.dimension_semantics<parallel>], iteration_bounds = array<i64: 2, 1>, scalar_prefetch = 0 : i64, scratch_operands = 0 : i64, tpu.core_type = #tpu.core_type<tc>, window_params = [{transform_indices = @transform_0, window_bounds = array<i64: 1, 128, 3>}, {pipeline_mode = #tpu.pipeline_mode<synchronous>, transform_indices = @transform_1, window_bounds = array<i64: 64, 3>}, {pipeline_mode = #tpu.pipeline_mode<synchronous>, transform_indices = @transform_2, window_bounds = array<i64: 64, 1>}, {transform_indices = @transform_3, window_bounds = array<i64: 1, 64, 128>}]} {
    %c0 = arith.constant 0 : index
    %c0_0 = arith.constant 0 : index
    %0 = vector.load %arg3[%c0, %c0_0] : memref<64x3xf32, #tpu.memory_space<vmem>>, vector<64x3xf32>
    %c0_1 = arith.constant 0 : index
    %c0_2 = arith.constant 0 : index
    %1 = vector.load %arg4[%c0_1, %c0_2] : memref<64x1xf32, #tpu.memory_space<vmem>>, vector<64x1xf32>
    %c0_3 = arith.constant 0 : index
    %c0_4 = arith.constant 0 : index
    %c0_5 = arith.constant 0 : index
    %2 = vector.load %arg2[%c0_3, %c0_4, %c0_5] : memref<1x128x3xf32, #tpu.memory_space<vmem>>, vector<1x128x3xf32>
    %3 = vector.shape_cast %2 : vector<1x128x3xf32> to vector<128x3xf32>
    %cst = arith.constant dense<0.000000e+00> : vector<64x128xf32>
    %4 = tpu.matmul %0, %3, %cst {dimension_numbers = #tpu.dot_dimension_numbers<[1], [1], [0], [0], [0, 0, 1, 0], [], []>} : vector<64x3xf32>, vector<128x3xf32>, vector<64x128xf32> -> vector<64x128xf32>
    %5 = vector.broadcast %1 : vector<64x1xf32> to vector<64x128xf32>
    %6 = arith.addf %4, %5 : vector<64x128xf32>
    %cst_6 = arith.constant 0.000000e+00 : f32
    %7 = vector.broadcast %cst_6 : f32 to vector<64x128xf32>
    %8 = arith.maximumf %6, %7 : vector<64x128xf32>
    %c0_7 = arith.constant 0 : index
    %c0_8 = arith.constant 0 : index
    %c0_9 = arith.constant 0 : index
    %9 = vector.load %arg5[%c0_7, %c0_8, %c0_9] : memref<1x64x128xf32, #tpu.memory_space<vmem>>, vector<1x64x128xf32>
    %10 = vector.shape_cast %9 : vector<1x64x128xf32> to vector<64x128xf32>
    %11 = vector.shape_cast %8 : vector<64x128xf32> to vector<1x64x128xf32>
    tpu.vector_store %arg5[%c0_7, %c0_8, %c0_9], %11 {strides = array<i32>} : memref<1x64x128xf32, #tpu.memory_space<vmem>>, vector<1x64x128xf32>,
    return
  }
  func.func @transform_0(%arg0: i32, %arg1: i32) -> (i32, i32, i32) {
    %c0_i32 = arith.constant 0 : i32
    %c0_i32_0 = arith.constant 0 : i32
    return %arg0, %arg1, %c0_i32 : i32, i32, i32
  }
  func.func @transform_1(%arg0: i32, %arg1: i32) -> (i32, i32) {
    %c0_i32 = arith.constant 0 : i32
    %c0_i32_0 = arith.constant 0 : i32
    %c0_i32_1 = arith.constant 0 : i32
    return %c0_i32, %c0_i32_0 : i32, i32
  }
  func.func @transform_2(%arg0: i32, %arg1: i32) -> (i32, i32) {
    %c0_i32 = arith.constant 0 : i32
    %c0_i32_0 = arith.constant 0 : i32
    %c0_i32_1 = arith.constant 0 : i32
    return %c0_i32, %c0_i32_0 : i32, i32
  }
  func.func @transform_3(%arg0: i32, %arg1: i32) -> (i32, i32, i32) {
    %c0_i32 = arith.constant 0 : i32
    %c0_i32_0 = arith.constant 0 : i32
    return %arg0, %c0_i32, %arg1 : i32, i32, i32
  }
}

</mosaic_0001>

<bundles_post_ra>
// kernel: tpu_custom_call.1
= control target key start
LH: loop header
LB: loop body
LE: loop exit
PB: predicated region body
PF: predicated region fallthrough
CT: control target
= control target key end

     0   :  { %8 = vsyncpa [#allocation3], 0  ;;  %s1115_s0 = inlined_call_operand.vmem [shape: f32[2,128,3], index: 0, kind: input, shape index: {}]   ;;  %s1116_s1 = inlined_call_operand.vmem [shape: f32[64,3], index: 1, kind: input, shape index: {}]   ;;  %s1117_s2 = inlined_call_operand.vmem [shape: f32[64,1], index: 2, kind: input, shape index: {}]   ;;  %s1118_s3 = inlined_call_operand.hbm [shape: f32[2,64,128], index: 3, kind: output, shape index: {}]  }
   0x1   :  { %10 = vsyncpa [#allocation3 + $0x1], 0  ;;  %s859_s12 = smov 0   ;;  %s861_s13 = smov 0  }
   0x2   :  { %s863_s14 = smov 0   ;;  %s865_s15 = smov 0  }
   0x3   :  { %s867_s16 = smov 0   ;;  %s869_s17 = smov 0  }
   0x4 LB: > { %s558_s18 = sadd.s32 4294967295, %s833_s17   ;;  %s559_s19 = sadd.s32 4294967294, %s833_s17   ;;  %s833_s17 = sphi %s869_s17, %s16_s17   ;;  %s829_s16 = sphi %s867_s16, %s1125_s16   ;;  %s825_s15 = sphi %s865_s15, %s1124_s15   ;;  %s821_s14 = sphi %s863_s14, %s1123_s14   ;;  %s817_s13 = sphi %s861_s13, %s1122_s13   ;;  %s813_s12 = sphi %s859_s12, %s1121_s12  }
   0x5   : > { %s28_s20 = sadd.s32 1, %s829_s16  ;;  %s107_s21 = sadd.s32 1, %s821_s14 }
   0x6   : > { %p30_p0 = scmp.ge.s32.totalorder %s28_s20, 2  ;;  %p117_p1 = scmp.ne.s32.totalorder %s821_s14, %s817_s13 }
   0x7   : > { %p118_p2 = scmp.eq.s32.totalorder %s558_s18, 1  ;;  %p123_p3 = scmp.ne.s32.totalorder %s817_s13, %s813_s12 }
   0x8   : > { %s1127_s20 = smov (%p30_p0, %s28_s20), 0  ;;  %p124_p5 = scmp.eq.s32.totalorder %s559_s19, 1 }
   0x9   : > { %p899_p4 = por %p118_p2, %p117_p1  ;;  %s102_s23 = ssub.s32 %s829_s16, %s1127_s20 }
   0xa   : > { %p562_p6 = scmp.ge.s32.totalorder %s833_s17, 1  ;;  %p105_p7 = scmp.eq.s32.totalorder %s102_s23, 0 }
   0xb   : > { %p906_p8 = por %p124_p5, %p123_p3  ;;  %p161_p9 = scmp.lt.s32.totalorder %s833_s17, 3 }
   0xc   : > { %s912_s25 = scalar_select %p105_p7, %s821_s14, %s107_s21  }
   0xd   : > { %p162_p10 = pnand %p562_p6, %p161_p9 }
   0xe   : > { %p190_p11 = scmp.lt.s32.totalorder (!%p162_p10), %s825_s15, 1  ;;  %s186_s29 = sand.u32 (!%p162_p10), 1, %s817_s13  }
   0xf   : > { %165 = sbr.rel (%p162_p10) target bundleno = 306 (0x132), region = 32  ;;  %s596_s5 = sshll.u32 (!%p162_p10), %s825_s15, 10 }
  0x10   : > { %s1064_s9 = scalar_lea.hbm (!%p162_p10), %s1118_s3, %s596_s5 }
  0x14   : > { %vm271_vm0 = vcmask 23552   ;;  %v199_v0 = vld [vmem:[%s1116_s1] sm:$0xff]  ;;  %s191_s30 = scalar_select %p190_p11, %s825_s15, 1  ;;  %v835_v2 = vmov 0   ;;  %v209_v3 = vld [vmem:[%s1117_s2 + $0x10] sm:$0xff]  ;;  %v210_v7 = vld [vmem:[%s1117_s2 + $0x18] sm:$0xff] }
  0x15   : > { %v203_v1 = vld [vmem:[%s1116_s1 + $0x20] sm:$0xff]  ;;  %653 = vmatprep.mubr.msk.f32.mxu0 %vm271_vm0, %v199_v0  ;;  %756 = vset.pattern.permute.xlu1 %v835_v2  ;;  %v208_v8 = vld [vmem:[%s1117_s2 + $0x8] sm:$0xff]  ;;  %v214_v13 = vld [vmem:[%s1117_s2 + $0x38] sm:$0xff]  ;;  %s1070_s15 = scalar_lea.sflag [#allocation3], %s186_s29 }
  0x16   : > { %659 = vmatprep.mubr.msk.f32.mxu1 %vm271_vm0, %v203_v1  ;;  %755 = vset.pattern.permute.xlu0 %v835_v2  ;;  %v207_v4 = vld [vmem:[%s1117_s2] sm:$0xff]  ;;  %s595_s8 = sshll.u32 %s191_s30, 7  ;;  %v212_v10 = vld [vmem:[%s1117_s2 + $0x28] sm:$0xff]  ;;  %v213_v14 = vld [vmem:[%s1117_s2 + $0x30] sm:$0xff]  ;;  %s563_s30 = sshll.u32 %s186_s29, 6 }
  0x17   : > { %243 = vperm.xlu1 %756, %v209_v3   ;;  %233 = vperm.xlu0 %755, %v207_v4   ;;  %s933_s11 = scalar_lea.vmem %s1115_s0, %s595_s8  ;;  %v211_v11 = vld [vmem:[%s1117_s2 + $0x20] sm:$0xff]  ;;  %v200_v27 = vld [vmem:[%s1116_s1 + $0x8] sm:$0xff]  ;;  %v201_v29 = vld [vmem:[%s1116_s1 + $0x10] sm:$0xff]  ;;  %s188_s4 = scalar_lea.vmem [#allocation2], %s563_s30 }
  0x18   : > { %v230_v5 = vld [vmem:[%s933_s11 + $0x78] sm:$0xff]  ;;  %v229_v6 = vld [vmem:[%s933_s11 + $0x70] sm:$0xff]  ;;  %v228_v9 = vld [vmem:[%s933_s11 + $0x68] sm:$0xff]  ;;  %s480_s6 = sshll.u32 %s188_s4, 4  ;;  %s1066_s6 = int_to_ptr.vmem [resolvable:$true] %s480_s6 }
  0x19   : > { %621 = vmatprep.subr.msk.mxu0 %vm271_vm0, %v230_v5  ;;  %665 = vmatprep.subr.msk.mxu1 %vm271_vm0, %v230_v5  ;;  %v227_v12 = vld [vmem:[%s933_s11 + $0x60] sm:$0xff]  ;;  %v226_v15 = vld [vmem:[%s933_s11 + $0x58] sm:$0xff]  ;;  %v225_v16 = vld [vmem:[%s933_s11 + $0x50] sm:$0xff]  ;;  %s757_s10 = scalar_lea.vmem %s1066_s6, 1024 }
  0x1a   : > { %622 = vmatpush3.xpose.msk.msra.mxu0 %vm271_vm0, %v230_v5  ;;  %681 = vmatpush3.xpose.msk.msra.mxu1 %vm271_vm0, %v230_v5  ;;  %v224_v17 = vld [vmem:[%s933_s11 + $0x48] sm:$0xff]  ;;  %v223_v18 = vld [vmem:[%s933_s11 + $0x40] sm:$0xff]  ;;  %v222_v19 = vld [vmem:[%s933_s11 + $0x38] sm:$0xff]  ;;  %p758_p12 = scmp.ne.s32.totalorder %s1066_s6, %s757_s10 }
  0x1b   : > { %623 = vmatprep.subr.msk.mxu0 %vm271_vm0, %v229_v6  ;;  %666 = vmatprep.subr.msk.mxu1 %vm271_vm0, %v229_v6  ;;  %v221_v20 = vld [vmem:[%s933_s11 + $0x30] sm:$0xff]  ;;  %v220_v21 = vld [vmem:[%s933_s11 + $0x28] sm:$0xff]  ;;  %v219_v22 = vld [vmem:[%s933_s11 + $0x20] sm:$0xff] }
  0x1c   : > { %248 = vperm.xlu1 %756, %v210_v7   ;;  %238 = vperm.xlu0 %755, %v208_v8   ;;  %v218_v23 = vld [vmem:[%s933_s11 + $0x18] sm:$0xff]  ;;  %v217_v24 = vld [vmem:[%s933_s11 + $0x10] sm:$0xff]  ;;  %v216_v25 = vld [vmem:[%s933_s11 + $0x8] sm:$0xff]  ;;  %p759_p13 = pnand %p758_p12, %p899_p4 }
  0x1d   : > { %v215_v26 = vld [vmem:[%s933_s11] sm:$0xff]  ;;  %v204_v28 = vld [vmem:[%s1116_s1 + $0x28] sm:$0xff]  ;;  %v205_v30 = vld [vmem:[%s1116_s1 + $0x30] sm:$0xff]  ;;  %s836_s11 = smov [#allocation2]  }
  0x1e   : > { %624 = vmatpush3.xpose.msk.msra.mxu0 %vm271_vm0, %v229_v6  ;;  %682 = vmatpush3.xpose.msk.msra.mxu1 %vm271_vm0, %v229_v6  ;;  %v202_v31 = vld [vmem:[%s1116_s1 + $0x18] sm:$0xff]  ;;  %p760_p0 = pneg %p759_p13  ;;  %s761_s18 = sshll.u32 %s836_s11, 4  ;;  %s762_s18 = int_to_ptr.vmem [resolvable:$false] %s761_s18 }
  0x1f   : > { %625 = vmatprep.subr.msk.mxu0 %vm271_vm0, %v228_v9  ;;  %667 = vmatprep.subr.msk.mxu1 %vm271_vm0, %v228_v9  ;;  %v206_v32 = vld [vmem:[%s1116_s1 + $0x38] sm:$0xff]  ;;  %s763_s19 = scalar_lea.vmem %s762_s18, 2048  ;;  %p764_p1 = scmp.lt.s32.totalorder %s1066_s6, %s762_s18 }
  0x20   : > { %258 = vperm.xlu1 %756, %v212_v10   ;;  %253 = vperm.xlu0 %755, %v211_v11   ;;  %p765_p2 = scmp.lt.s32.totalorder %s763_s19, %s757_s10 }
  0x22   : > { %626 = vmatpush3.xpose.msk.msra.mxu0 %vm271_vm0, %v228_v9  ;;  %683 = vmatpush3.xpose.msk.msra.mxu1 %vm271_vm0, %v228_v9  ;;  %p766_p3 = por %p765_p2, %p764_p1 }
  0x23   : > { %627 = vmatprep.subr.msk.mxu0 %vm271_vm0, %v227_v12  ;;  %668 = vmatprep.subr.msk.mxu1 %vm271_vm0, %v227_v12 }
  0x24   : > { %268 = vperm.xlu1 %756, %v214_v13   ;;  %263 = vperm.xlu0 %755, %v213_v14   ;;  %p767_p5 = pnand %p766_p3, %p760_p0 }
  0x26   : > { %628 = vmatpush3.xpose.msk.msra.mxu0 %vm271_vm0, %v227_v12  ;;  %684 = vmatpush3.xpose.msk.msra.mxu1 %vm271_vm0, %v227_v12 }
  0x27   : > { %629 = vmatprep.subr.msk.mxu0 %vm271_vm0, %v226_v15  ;;  %669 = vmatprep.subr.msk.mxu1 %vm271_vm0, %v226_v15 }
  0x2a   : > { %630 = vmatpush3.xpose.msk.msra.mxu0 %vm271_vm0, %v226_v15  ;;  %685 = vmatpush3.xpose.msk.msra.mxu1 %vm271_vm0, %v226_v15 }
  0x2b   : > { %631 = vmatprep.subr.msk.mxu0 %vm271_vm0, %v225_v16  ;;  %670 = vmatprep.subr.msk.mxu1 %vm271_vm0, %v225_v16 }
  0x2e   : > { %632 = vmatpush3.xpose.msk.msra.mxu0 %vm271_vm0, %v225_v16  ;;  %686 = vmatpush3.xpose.msk.msra.mxu1 %vm271_vm0, %v225_v16 }
  0x2f   : > { %633 = vmatprep.subr.msk.mxu0 %vm271_vm0, %v224_v17  ;;  %671 = vmatprep.subr.msk.mxu1 %vm271_vm0, %v224_v17 }
  0x32   : > { %634 = vmatpush3.xpose.msk.msra.mxu0 %vm271_vm0, %v224_v17  ;;  %687 = vmatpush3.xpose.msk.msra.mxu1 %vm271_vm0, %v224_v17 }
  0x33   : > { %635 = vmatprep.subr.msk.mxu0 %vm271_vm0, %v223_v18  ;;  %672 = vmatprep.subr.msk.mxu1 %vm271_vm0, %v223_v18 }
  0x36   : > { %636 = vmatpush3.xpose.msk.msra.mxu0 %vm271_vm0, %v223_v18  ;;  %688 = vmatpush3.xpose.msk.msra.mxu1 %vm271_vm0, %v223_v18 }
  0x37   : > { %637 = vmatprep.subr.msk.mxu0 %vm271_vm0, %v222_v19  ;;  %673 = vmatprep.subr.msk.mxu1 %vm271_vm0, %v222_v19 }
  0x3a   : > { %638 = vmatpush3.xpose.msk.msra.mxu0 %vm271_vm0, %v222_v19  ;;  %689 = vmatpush3.xpose.msk.msra.mxu1 %vm271_vm0, %v222_v19 }
  0x3b   : > { %639 = vmatprep.subr.msk.mxu0 %vm271_vm0, %v221_v20  ;;  %674 = vmatprep.subr.msk.mxu1 %vm271_vm0, %v221_v20 }
  0x3e   : > { %640 = vmatpush3.xpose.msk.msra.mxu0 %vm271_vm0, %v221_v20  ;;  %690 = vmatpush3.xpose.msk.msra.mxu1 %vm271_vm0, %v221_v20 }
  0x3f   : > { %641 = vmatprep.subr.msk.mxu0 %vm271_vm0, %v220_v21  ;;  %675 = vmatprep.subr.msk.mxu1 %vm271_vm0, %v220_v21 }
  0x42   : > { %642 = vmatpush3.xpose.msk.msra.mxu0 %vm271_vm0, %v220_v21  ;;  %691 = vmatpush3.xpose.msk.msra.mxu1 %vm271_vm0, %v220_v21 }
  0x43   : > { %643 = vmatprep.subr.msk.mxu0 %vm271_vm0, %v219_v22  ;;  %676 = vmatprep.subr.msk.mxu1 %vm271_vm0, %v219_v22 }
  0x46   : > { %644 = vmatpush3.xpose.msk.msra.mxu0 %vm271_vm0, %v219_v22  ;;  %692 = vmatpush3.xpose.msk.msra.mxu1 %vm271_vm0, %v219_v22 }
  0x47   : > { %645 = vmatprep.subr.msk.mxu0 %vm271_vm0, %v218_v23  ;;  %677 = vmatprep.subr.msk.mxu1 %vm271_vm0, %v218_v23 }
  0x4a   : > { %646 = vmatpush3.xpose.msk.msra.mxu0 %vm271_vm0, %v218_v23  ;;  %693 = vmatpush3.xpose.msk.msra.mxu1 %vm271_vm0, %v218_v23 }
  0x4b   : > { %647 = vmatprep.subr.msk.mxu0 %vm271_vm0, %v217_v24  ;;  %678 = vmatprep.subr.msk.mxu1 %vm271_vm0, %v217_v24 }
  0x4e   : > { %648 = vmatpush3.xpose.msk.msra.mxu0 %vm271_vm0, %v217_v24  ;;  %694 = vmatpush3.xpose.msk.msra.mxu1 %vm271_vm0, %v217_v24 }
  0x4f   : > { %649 = vmatprep.subr.msk.mxu0 %vm271_vm0, %v216_v25  ;;  %679 = vmatprep.subr.msk.mxu1 %vm271_vm0, %v216_v25 }
  0x52   : > { %650 = vmatpush3.xpose.msk.msra.mxu0 %vm271_vm0, %v216_v25  ;;  %695 = vmatpush3.xpose.msk.msra.mxu1 %vm271_vm0, %v216_v25 }
  0x53   : > { %651 = vmatprep.subr.msk.mxu0 %vm271_vm0, %v215_v26  ;;  %680 = vmatprep.subr.msk.mxu1 %vm271_vm0, %v215_v26 }
  0x56   : > { %652 = vmatpush3.xpose.msk.msra.mxu0 %vm271_vm0, %v215_v26  ;;  %696 = vmatpush3.xpose.msk.msra.mxu1 %vm271_vm0, %v215_v26 }
  0x59   : > { %654 = vmatmul.mubr.msk.f32.vlgmr.msra.gmra.mxu0 %vm271_vm0, %v200_v27  ;;  %660 = vmatmul.mubr.msk.f32.vlgmr.msra.gmra.mxu1 %vm271_vm0, %v204_v28 }
  0x5a   : > { %656 = vmatprep.mubr.msk.f32.mxu0 %vm271_vm0, %v201_v29  ;;  %662 = vmatprep.mubr.msk.f32.mxu1 %vm271_vm0, %v205_v30 }
  0x5d   : > { %657 = vmatmul.mubr.msk.f32.gmra.mxu0 %vm271_vm0, %v202_v31  ;;  %663 = vmatmul.mubr.msk.f32.gmra.mxu1 %vm271_vm0, %v206_v32 }
  0x92   : > { %v244_v33 = vpop.permute.xlu1 %243  ;;  %v234_v34 = vpop.permute.xlu0 %233 }
  0x97   : > { %v249_v35 = vpop.permute.xlu1 %248  ;;  %v239_v36 = vpop.permute.xlu0 %238 }
  0x9b   : > { %v259_v37 = vpop.permute.xlu1 %258  ;;  %v254_v38 = vpop.permute.xlu0 %253 }
  0x9f   : > { %v269_v45 = vpop.permute.xlu1 %268  ;;  %v264_v52 = vpop.permute.xlu0 %263 }
 0x119   : > { %v655_v39 = vpop.f32.mrf.mxu0  ;;  %v661_v40 = vpop.f32.mrf.mxu1 }
 0x11a   : > { %v416_v41 = vadd.f32 %v655_v39, %v239_v36  ;;  %v436_v42 = vadd.f32 %v661_v40, %v259_v37 }
 0x11b   : > { %v410_v43 = vpop.f32.mrf.mxu0  ;;  %v430_v44 = vpop.f32.mrf.mxu1 }
 0x11c   : > { %v450_v46 = vmax.f32 %v416_v41, 0.0  ;;  %v454_v47 = vmax.f32 %v436_v42, 0.0  ;;  %v411_v48 = vadd.f32 %v410_v43, %v234_v34  ;;  %v431_v49 = vadd.f32 %v430_v44, %v254_v38 }
 0x11d   : > { %v658_v50 = vpop.f32.mrf.mxu0  ;;  %v664_v51 = vpop.f32.mrf.mxu1 }
 0x11e   : > { %458 = vst [vmem:[%s188_s4 + $0x8] sm:$0xff] %v450_v46  ;;  %462 = vst [vmem:[%s188_s4 + $0x28] sm:$0xff] %v454_v47  ;;  %v449_v53 = vmax.f32 %v411_v48, 0.0  ;;  %v453_v54 = vmax.f32 %v431_v49, 0.0  ;;  %v426_v55 = vadd.f32 %v658_v50, %v249_v35  ;;  %v446_v56 = vadd.f32 %v664_v51, %v269_v45 }
 0x11f   : > { %v420_v57 = vpop.f32.mrf.mxu0  ;;  %v440_v58 = vpop.f32.mrf.mxu1 }
 0x120   : > { %457 = vst [vmem:[%s188_s4] sm:$0xff] %v449_v53  ;;  %461 = vst [vmem:[%s188_s4 + $0x20] sm:$0xff] %v453_v54  ;;  %v452_v59 = vmax.f32 %v426_v55, 0.0  ;;  %v456_v60 = vmax.f32 %v446_v56, 0.0  ;;  %v421_v61 = vadd.f32 %v420_v57, %v244_v33  ;;  %v441_v62 = vadd.f32 %v440_v58, %v264_v52 }
 0x122   : > { %460 = vst [vmem:[%s188_s4 + $0x18] sm:$0xff] %v452_v59  ;;  %464 = vst [vmem:[%s188_s4 + $0x38] sm:$0xff] %v456_v60  ;;  %v451_v63 = vmax.f32 %v421_v61, 0.0  ;;  %v455_v0 = vmax.f32 %v441_v62, 0.0 }
 0x124   : > { %459 = vst [vmem:[%s188_s4 + $0x10] sm:$0xff] %v451_v63  ;;  %463 = vst [vmem:[%s188_s4 + $0x30] sm:$0xff] %v455_v0 }
 0x125   : > { %770 = shalt.err (!%p767_p5)
}
 0x126   : > { %s771_s21 = scalar_lea.hbm %s1064_s9, 1024  ;;  %s775_s27 = scalar_lea.hbm %s1118_s3, 2048 }
 0x127   : > { %p772_p6 = scmp.ne.s32.totalorder %s1064_s9, %s771_s21  ;;  %p776_p10 = scmp.lt.s32.totalorder %s1064_s9, %s1118_s3 }
 0x128   : > { %p777_p11 = scmp.lt.s32.totalorder %s775_s27, %s771_s21 }
 0x129   : > { %p773_p7 = pnand %p772_p6, %p899_p4 }
 0x12a   : > { %p778_p12 = por %p777_p11, %p776_p10 }
 0x12b   : > { %p774_p9 = pneg %p773_p7 }
 0x12d   : > { %p779_p13 = pnand %p778_p12, %p774_p9 }
 0x12f   : > { %782 = shalt.err (!%p779_p13)
}
 0x130   : > { %s837_s30 = smov 128   ;;  %s838_s4 = smov 8  }
 0x131   : > { %697 = dma.vmem_to_hbm [thread:$0]  (%p899_p4), %s1066_s6, 1024, %s1064_s9, %s1070_s15, %s837_s30, %s837_s30, %s838_s4  }
 0x132 PF: > { %p703_p0 = scmp.ge.s32.totalorder %s833_s17, 2  ;;  %s495_s5 = sand.u32 1, %s813_s12  }
 0x133   : > { %s496_s7 = scalar_lea.sflag [#allocation3], %s495_s5 }
 0x134   : > { %p700_p1 = pnand %p703_p0, %p906_p8 }
 0x136   : > { %p701_p2 = pneg %p700_p1 }
 0x138   : > { %808 = dma.done.wait (%p701_p2), %s496_s7, 1024  }
 0x139   : > { %810 = vsyncadd (%p701_p2), %s496_s7, 4294966272  ;;  %s16_s17 = sadd.s32 1, %s833_s17   ;;  %s1121_s12 = smov %s817_s13 }
 0x13a   : > { %p13_p3 = scmp.ge.s32.totalorder %s16_s17, 4   ;;  %s1122_s13 = smov %s821_s14 }
 0x13b   : > { %s1123_s14 = smov %s912_s25  ;;  %s1124_s15 = smov %s829_s16 }
 0x13c   : > { %s1125_s16 = smov %s1127_s20  ;;  %15 = sbr.rel (!%p13_p3) target bundleno = 4 (0x4), region = 67 }
 0x141   :  { %501 = vsyncpa [#allocation3], 1 }
 0x142   :  { %503 = vsyncpa [#allocation3 + $0x1], 1 }

</bundles_post_ra>
